<compile_context>
chip_gen: v6e
topology: v6e:2x2x1
jax: 0.10.0
libtpu: 0.0.40
codegen_flags: <defaults>
</compile_context>

<pallas_src>
import functools
import math

import jax
import jax.numpy as jnp
from jax.experimental import pallas as pl
from jax.experimental.pallas import tpu as pltpu


# ---------------------------------------------------------------------------
# small helpers
# ---------------------------------------------------------------------------
def _round_up(x, m):
    return ((x + m - 1) // m) * m


def _lcm(a, b):
    return a * b // math.gcd(a, b)


def _pad2d(a, rows, cols):
    r, c = a.shape
    if (r, c) == (rows, cols):
        return a
    return jnp.pad(a, ((0, rows - r), (0, cols - c)))


def _log_sigmoid(z):
    # log(sigmoid(z)) = -softplus(-z); written with exp/log/abs/min only so it
    # lowers cleanly in Mosaic and stays finite for very negative z.
    return jnp.minimum(z, 0.0) - jnp.log(1.0 + jnp.exp(-jnp.abs(z)))


# ---------------------------------------------------------------------------
# 1) Fully fused kernel: all layers + loss in a single pallas_call
# ---------------------------------------------------------------------------
def _fused_decoder_loss_kernel(*refs, n_layers, batch_real, dout_real, compute_dtype):
    x_ref, t_ref = refs[0], refs[1]
    o_ref = refs[-1]
    wb_refs = refs[2:-1]  # (w0, b0, w1, b1, ...)

    h = x_ref[...]                      # compute_dtype
    z = None
    for i in range(n_layers):
        w = wb_refs[2 * i][...]                         # compute_dtype
        b = wb_refs[2 * i + 1][...].astype(jnp.float32)  # (1, dout_p)
        z = jnp.dot(h.astype(compute_dtype), w,
                    preferred_element_type=jnp.float32) + b
        if i < n_layers - 1:
            h = jnp.maximum(z, 0.0)      # ReLU, stays f32

    # Final layer: sigmoid + loss, computed from the logits z (log-sigmoid trick).
    t = t_ref[...].astype(jnp.float32)
    p = jax.nn.sigmoid(z)
    log_p = _log_sigmoid(z)

    bp, dp = p.shape
    rows = jax.lax.broadcasted_iota(jnp.int32, (bp, dp), 0)
    cols = jax.lax.broadcasted_iota(jnp.int32, (bp, dp), 1)
    mask = (rows < batch_real) & (cols < dout_real)

    diff = t - p
    mse = jnp.sum(jnp.where(mask, diff * diff, 0.0)) / jnp.float32(batch_real * dout_real)
    kl = jnp.sum(jnp.where(mask, p * (log_p - t), 0.0)) / jnp.float32(batch_real)
    o_ref[0, 0] = mse + kl


def decoder_g_loss_fused(params, x, true_x, *, compute_dtype=jnp.bfloat16):
    """Single-pallas_call fused forward + loss (small / medium sizes)."""
    batch, d0 = x.shape
    n_layers = len(params)
    d_last = params[-1][1].shape[0]

    b_pad = _round_up(batch, 8)
    x_p = _pad2d(x.astype(compute_dtype), b_pad, _round_up(d0, 128))
    t_p = _pad2d(true_x.astype(jnp.float32), b_pad, _round_up(d_last, 128))

    args = [x_p, t_p]
    for (w, b) in params:
        din, dout = w.shape
        args.append(_pad2d(w.astype(compute_dtype),
                           _round_up(din, 128), _round_up(dout, 128)))
        args.append(_pad2d(b.reshape(1, -1).astype(jnp.float32),
                           1, _round_up(dout, 128)))

    kernel = functools.partial(
        _fused_decoder_loss_kernel,
        n_layers=n_layers, batch_real=batch, dout_real=d_last,
        compute_dtype=compute_dtype)

    loss = pl.pallas_call(
        kernel,
        out_shape=jax.ShapeDtypeStruct((1, 1), jnp.float32),
        in_specs=[pl.BlockSpec(memory_space=pltpu.VMEM)] * len(args),
        out_specs=pl.BlockSpec(memory_space=pltpu.SMEM),
    )(*args)
    return loss[0, 0]


# ---------------------------------------------------------------------------
# 2) Tiled fallback path (production-sized layers)
# ---------------------------------------------------------------------------
def _tiled_linear_kernel(x_ref, w_ref, b_ref, o_ref, acc_ref, *, activation):
    k = pl.program_id(2)

    @pl.when(k == 0)
    def _():
        acc_ref[...] = jnp.zeros_like(acc_ref)

    acc_ref[...] += jnp.dot(x_ref[...], w_ref[...],
                            preferred_element_type=jnp.float32)

    @pl.when(k == pl.num_programs(2) - 1)
    def _():
        y = acc_ref[...] + b_ref[...].astype(jnp.float32)
        if activation == "relu":
            y = jnp.maximum(y, 0.0)
        elif activation == "sigmoid":
            y = jax.nn.sigmoid(y)
        o_ref[...] = y.astype(o_ref.dtype)


def _tiled_linear(h, w_p, b_p, *, activation, out_dtype, tm, tn, tk):
    b_pad, k_pad = h.shape
    k_pad2, n_pad = w_p.shape
    assert k_pad == k_pad2
    grid = (b_pad // tm, n_pad // tn, k_pad // tk)
    return pl.pallas_call(
        functools.partial(_tiled_linear_kernel, activation=activation),
        out_shape=jax.ShapeDtypeStruct((b_pad, n_pad), out_dtype),
        grid_spec=pltpu.PrefetchScalarGridSpec(
            num_scalar_prefetch=0,
            grid=grid,
            in_specs=[
                pl.BlockSpec((tm, tk), lambda i, j, k: (i, k)),
                pl.BlockSpec((tk, tn), lambda i, j, k: (k, j)),
                pl.BlockSpec((1, tn), lambda i, j, k: (0, j)),
            ],
            out_specs=pl.BlockSpec((tm, tn), lambda i, j, k: (i, j)),
            scratch_shapes=[pltpu.VMEM((tm, tn), jnp.float32)],
        ),
        compiler_params=pltpu.CompilerParams(
            dimension_semantics=("parallel", "parallel", "arbitrary")),
    )(h, w_p, b_p)


def _tiled_loss_kernel(t_ref, z_ref, o_ref, acc_ref, *,
                       batch_real, dout_real, tm, tn):
    i = pl.program_id(0)
    j = pl.program_id(1)

    @pl.when(jnp.logical_and(i == 0, j == 0))
    def _():
        acc_ref[0] = 0.0

    z = z_ref[...].astype(jnp.float32)
    t = t_ref[...].astype(jnp.float32)
    p = jax.nn.sigmoid(z)
    log_p = _log_sigmoid(z)

    rows = i * tm + jax.lax.broadcasted_iota(jnp.int32, (tm, tn), 0)
    cols = j * tn + jax.lax.broadcasted_iota(jnp.int32, (tm, tn), 1)
    mask = (rows < batch_real) & (cols < dout_real)

    diff = t - p
    mse_part = jnp.sum(jnp.where(mask, diff * diff, 0.0)) / jnp.float32(batch_real * dout_real)
    kl_part = jnp.sum(jnp.where(mask, p * (log_p - t), 0.0)) / jnp.float32(batch_real)
    acc_ref[0] += mse_part + kl_part

    @pl.when(jnp.logical_and(i == pl.num_programs(0) - 1,
                             j == pl.num_programs(1) - 1))
    def _():
        # Lane-dense (8,128) output block; wrapper reads element [0, 0].
        o_ref[...] = jnp.full((8, 128), acc_ref[0], dtype=jnp.float32)


def _tiled_loss(t_p, z_p, *, batch_real, dout_real, tm, tn):
    b_pad, n_pad = z_p.shape
    grid = (b_pad // tm, n_pad // tn)
    out = pl.pallas_call(
        functools.partial(_tiled_loss_kernel, batch_real=batch_real,
                          dout_real=dout_real, tm=tm, tn=tn),
        out_shape=jax.ShapeDtypeStruct((8, 128), jnp.float32),
        grid_spec=pltpu.PrefetchScalarGridSpec(
            num_scalar_prefetch=0,
            grid=grid,
            in_specs=[
                pl.BlockSpec((tm, tn), lambda i, j: (i, j)),
                pl.BlockSpec((tm, tn), lambda i, j: (i, j)),
            ],
            out_specs=pl.BlockSpec((8, 128), lambda i, j: (0, 0)),
            scratch_shapes=[pltpu.SMEM((1,), jnp.float32)],
        ),
        compiler_params=pltpu.CompilerParams(
            dimension_semantics=("arbitrary", "arbitrary")),
    )(t_p, z_p)
    return out[0, 0]


def decoder_g_loss_tiled(params, x, true_x, *, compute_dtype=jnp.bfloat16,
                         tm=128, tn=256, tk=256):
    """Gridded/tiled path for large batch / wide filters."""
    batch = x.shape[0]
    n_layers = len(params)
    d_last = params[-1][1].shape[0]
    feat_mult = _lcm(tn, tk)

    b_pad = _round_up(batch, tm)
    h = _pad2d(x.astype(compute_dtype), b_pad, _round_up(x.shape[1], tk))

    for i, (w, b) in enumerate(params):
        din, dout = w.shape
        din_p = h.shape[1]                       # already a multiple of tk
        dout_p = _round_up(dout, feat_mult)
        w_p = _pad2d(w.astype(compute_dtype), din_p, dout_p)
        b_p = _pad2d(b.reshape(1, -1).astype(jnp.float32), 1, dout_p)
        last = (i == n_layers - 1)
        h = _tiled_linear(
            h, w_p, b_p,
            activation=None if last else "relu",    # last layer emits logits
            out_dtype=jnp.float32 if last else compute_dtype,
            tm=tm, tn=tn, tk=tk)

    t_p = _pad2d(true_x.astype(jnp.float32), b_pad, h.shape[1])
    return _tiled_loss(t_p, h, batch_real=batch, dout_real=d_last, tm=tm, tn=tn)


# ---------------------------------------------------------------------------
# Dispatcher
# ---------------------------------------------------------------------------
def _fused_footprint_bytes(params, x, true_x, compute_dtype):
    cb = jnp.dtype(compute_dtype).itemsize
    b_pad = _round_up(x.shape[0], 8)
    total = b_pad * _round_up(x.shape[1], 128) * cb
    total += b_pad * _round_up(true_x.shape[1], 128) * 4
    widest = 128
    for w, _ in params:
        din_p = _round_up(w.shape[0], 128)
        dout_p = _round_up(w.shape[1], 128)
        total += din_p * dout_p * cb + dout_p * 4
        widest = max(widest, dout_p)
    total += 3 * b_pad * widest * 4  # live activation working set (rough)
    return total


def decoder_g_loss(params, x, true_x, *, compute_dtype=jnp.bfloat16):
    """Forward pass of Decoder_G returning the scalar loss."""
    if _fused_footprint_bytes(params, x, true_x, compute_dtype) < 24 * (1 << 20):
        return decoder_g_loss_fused(params, x, true_x, compute_dtype=compute_dtype)
    return decoder_g_loss_tiled(params, x, true_x, compute_dtype=compute_dtype)


# ---------------------------------------------------------------------------
# Parameter init (mirrors nn.Linear + kaiming_uniform_) and pure-JAX reference
# ---------------------------------------------------------------------------
def init_params(key, filters):
    params = []
    for i in range(len(filters) - 1):
        din, dout = filters[i], filters[i + 1]
        key, kw, kb = jax.random.split(key, 3)
        w_bound = (6.0 / din) ** 0.5                 # kaiming_uniform_, fan_in
        w = jax.random.uniform(kw, (din, dout), jnp.float32, -w_bound, w_bound)
        b_bound = 1.0 / (din ** 0.5)                 # default nn.Linear bias init
        b = jax.random.uniform(kb, (dout,), jnp.float32, -b_bound, b_bound)
        params.append((w, b))
    return params


def _reference_loss(params, x, true_x, compute_dtype=None):
    n_layers = len(params)
    h = x if compute_dtype is None else x.astype(compute_dtype)
    z = None
    for i, (w, b) in enumerate(params):
        wc = w if compute_dtype is None else w.astype(compute_dtype)
        z = jnp.dot(h, wc, preferred_element_type=jnp.float32) + b.astype(jnp.float32)
        if i < n_layers - 1:
            h = jnp.maximum(z, 0.0)
            if compute_dtype is not None:
                h = h.astype(compute_dtype)
    p = jax.nn.sigmoid(z)
    log_p = _log_sigmoid(z)
    mse = jnp.mean((true_x - p) ** 2)
    kl = jnp.sum(p * (log_p - true_x)) / true_x.shape[0]
    return mse + kl


# ---------------------------------------------------------------------------
if __name__ == "__main__":
    key = jax.random.PRNGKey(0)

    # ---- small config (fused single-kernel path) --------------------------
    filters = [32, 64, 16]     # `filter` arg of Decoder_G
    batch = 8
    key, kx, kt, kp = jax.random.split(key, 4)
    params = init_params(kp, filters)
    x = jax.random.normal(kx, (batch, filters[0]), jnp.float32)
    true_x = jax.random.uniform(kt, (batch, filters[-1]), jnp.float32, 0.05, 0.95)

    loss = jax.block_until_ready(decoder_g_loss(params, x, true_x))
    ref_bf16 = _reference_loss(params, x, true_x, compute_dtype=jnp.bfloat16)
    ref_f32 = _reference_loss(params, x, true_x)
    assert jnp.allclose(loss, ref_bf16, rtol=1e-2, atol=1e-2), (loss, ref_bf16)
    assert jnp.allclose(loss, ref_f32, rtol=5e-2, atol=5e-2), (loss, ref_f32)

    # ---- larger config (exercises the tiled / gridded fallback path) ------
    filters2 = [300, 500, 260]
    batch2 = 160
    key, kx2, kt2, kp2 = jax.random.split(key, 4)
    params2 = init_params(kp2, filters2)
    x2 = jax.random.normal(kx2, (batch2, filters2[0]), jnp.float32)
    true_x2 = jax.random.uniform(kt2, (batch2, filters2[-1]), jnp.float32, 0.05, 0.95)

    loss2 = jax.block_until_ready(
        decoder_g_loss_tiled(params2, x2, true_x2, tm=128, tn=256, tk=256))
    ref2 = _reference_loss(params2, x2, true_x2, compute_dtype=jnp.bfloat16)
    assert jnp.allclose(loss2, ref2, rtol=1e-2, atol=1e-2), (loss2, ref2)

    print("KERNEL_OK")
</pallas_src>

<mosaic_0001>
module attributes {stable_mosaic.version = 11 : i64} {
  func.func @_fused_decoder_loss_kernel(%arg0: memref<8x128xbf16, #tpu.memory_space<vmem>>, %arg1: memref<8x128xf32, #tpu.memory_space<vmem>>, %arg2: memref<128x128xbf16, #tpu.memory_space<vmem>>, %arg3: memref<1x128xf32, #tpu.memory_space<vmem>>, %arg4: memref<128x128xbf16, #tpu.memory_space<vmem>>, %arg5: memref<1x128xf32, #tpu.memory_space<vmem>>, %arg6: memref<1x1xf32, #tpu.memory_space<smem>>) attributes {dimension_semantics = [], scalar_prefetch = 0 : i64, scratch_operands = 0 : i64, tpu.core_type = #tpu.core_type<tc>} {
    %c0 = arith.constant 0 : index
    %c0_0 = arith.constant 0 : index
    %0 = vector.load %arg0[%c0, %c0_0] : memref<8x128xbf16, #tpu.memory_space<vmem>>, vector<8x128xbf16>
    %c0_1 = arith.constant 0 : index
    %c0_2 = arith.constant 0 : index
    %1 = vector.load %arg2[%c0_1, %c0_2] : memref<128x128xbf16, #tpu.memory_space<vmem>>, vector<128x128xbf16>
    %c0_3 = arith.constant 0 : index
    %c0_4 = arith.constant 0 : index
    %2 = vector.load %arg3[%c0_3, %c0_4] : memref<1x128xf32, #tpu.memory_space<vmem>>, vector<1x128xf32>
    %cst = arith.constant dense<0.000000e+00> : vector<8x128xf32>
    %3 = tpu.matmul %0, %1, %cst {dimension_numbers = #tpu.dot_dimension_numbers<[1], [0], [0], [1], [0, 0, 1, 1], [], []>} : vector<8x128xbf16>, vector<128x128xbf16>, vector<8x128xf32> -> vector<8x128xf32>
    %4 = vector.broadcast %2 : vector<1x128xf32> to vector<8x128xf32>
    %5 = arith.addf %3, %4 : vector<8x128xf32>
    %cst_5 = arith.constant 0.000000e+00 : f32
    %6 = vector.broadcast %cst_5 : f32 to vector<8x128xf32>
    %7 = arith.maximumf %5, %6 : vector<8x128xf32>
    %c0_6 = arith.constant 0 : index
    %c0_7 = arith.constant 0 : index
    %8 = vector.load %arg4[%c0_6, %c0_7] : memref<128x128xbf16, #tpu.memory_space<vmem>>, vector<128x128xbf16>
    %c0_8 = arith.constant 0 : index
    %c0_9 = arith.constant 0 : index
    %9 = vector.load %arg5[%c0_8, %c0_9] : memref<1x128xf32, #tpu.memory_space<vmem>>, vector<1x128xf32>
    %10 = arith.truncf %7 : vector<8x128xf32> to vector<8x128xbf16>
    %cst_10 = arith.constant dense<0.000000e+00> : vector<8x128xf32>
    %11 = tpu.matmul %10, %8, %cst_10 {dimension_numbers = #tpu.dot_dimension_numbers<[1], [0], [0], [1], [0, 0, 1, 1], [], []>} : vector<8x128xbf16>, vector<128x128xbf16>, vector<8x128xf32> -> vector<8x128xf32>
    %12 = vector.broadcast %9 : vector<1x128xf32> to vector<8x128xf32>
    %13 = arith.addf %11, %12 : vector<8x128xf32>
    %c0_11 = arith.constant 0 : index
    %c0_12 = arith.constant 0 : index
    %14 = vector.load %arg1[%c0_11, %c0_12] : memref<8x128xf32, #tpu.memory_space<vmem>>, vector<8x128xf32>
    %15 = arith.negf %13 : vector<8x128xf32>
    %16 = math.exp %15 : vector<8x128xf32>
    %cst_13 = arith.constant 1.000000e+00 : f32
    %17 = vector.broadcast %cst_13 : f32 to vector<8x128xf32>
    %18 = arith.addf %17, %16 : vector<8x128xf32>
    %19 = arith.divf %17, %18 : vector<8x128xf32>
    %cst_14 = arith.constant 0.000000e+00 : f32
    %20 = vector.broadcast %cst_14 : f32 to vector<8x128xf32>
    %21 = arith.minimumf %13, %20 : vector<8x128xf32>
    %22 = math.absf %13 : vector<8x128xf32>
    %cst_15 = arith.constant 0.000000e+00 : f32
    %23 = vector.broadcast %cst_15 : f32 to vector<8x128xf32>
    %24 = arith.subf %23, %22 : vector<8x128xf32>
    %25 = math.exp %24 : vector<8x128xf32>
    %cst_16 = arith.constant 1.000000e+00 : f32
    %26 = vector.broadcast %cst_16 : f32 to vector<8x128xf32>
    %27 = arith.addf %26, %25 : vector<8x128xf32>
    %28 = math.log %27 : vector<8x128xf32>
    %29 = arith.subf %21, %28 : vector<8x128xf32>
    %30 = tpu.iota {dimensions = array<i32: 0>} : vector<8x128xi32>
    %31 = tpu.iota {dimensions = array<i32: 1>} : vector<8x128xi32>
    %c8_i32 = arith.constant 8 : i32
    %32 = vector.broadcast %c8_i32 : i32 to vector<8x128xi32>
    %33 = arith.cmpi slt, %30, %32 : vector<8x128xi32>
    %c16_i32 = arith.constant 16 : i32
    %34 = vector.broadcast %c16_i32 : i32 to vector<8x128xi32>
    %35 = arith.cmpi slt, %31, %34 : vector<8x128xi32>
    %36 = arith.andi %33, %35 : vector<8x128xi1>
    %37 = arith.subf %14, %19 : vector<8x128xf32>
    %38 = arith.mulf %37, %37 : vector<8x128xf32>
    %cst_17 = arith.constant 0.000000e+00 : f32
    %39 = vector.broadcast %cst_17 : f32 to vector<8x128xf32>
    %40 = arith.select %36, %38, %39 : vector<8x128xi1>, vector<8x128xf32>
    %41 = vector.shape_cast %40 : vector<8x128xf32> to vector<1x8x128xf32>
    %cst_18 = arith.constant dense<0.000000e+00> : vector<1xf32>
    %42 = vector.multi_reduction <add>, %41, %cst_18 [1, 2] : vector<1x8x128xf32> to vector<1xf32>
    %43 = vector.shape_cast %42 : vector<1xf32> to vector<1x1x1xf32>
    %44 = vector.extract %43[0, 0, 0] : f32 from vector<1x1x1xf32>
    %cst_19 = arith.constant 1.280000e+02 : f32
    %45 = arith.divf %44, %cst_19 : f32
    %46 = arith.subf %29, %14 : vector<8x128xf32>
    %47 = arith.mulf %19, %46 : vector<8x128xf32>
    %cst_20 = arith.constant 0.000000e+00 : f32
    %48 = vector.broadcast %cst_20 : f32 to vector<8x128xf32>
    %49 = arith.select %36, %47, %48 : vector<8x128xi1>, vector<8x128xf32>
    %50 = vector.shape_cast %49 : vector<8x128xf32> to vector<1x8x128xf32>
    %cst_21 = arith.constant dense<0.000000e+00> : vector<1xf32>
    %51 = vector.multi_reduction <add>, %50, %cst_21 [1, 2] : vector<1x8x128xf32> to vector<1xf32>
    %52 = vector.shape_cast %51 : vector<1xf32> to vector<1x1x1xf32>
    %53 = vector.extract %52[0, 0, 0] : f32 from vector<1x1x1xf32>
    %cst_22 = arith.constant 8.000000e+00 : f32
    %54 = arith.divf %53, %cst_22 : f32
    %55 = arith.addf %45, %54 : f32
    %c0_23 = arith.constant 0 : index
    %c0_24 = arith.constant 0 : index
    %56 = memref.load %arg6[%c0_23, %c0_24] : memref<1x1xf32, #tpu.memory_space<smem>>
    memref.store %55, %arg6[%c0_23, %c0_24] : memref<1x1xf32, #tpu.memory_space<smem>>
    return
  }
}

</mosaic_0001>

<bundles_post_ra>
// kernel: tpu_custom_call.1
= control target key start
LH: loop header
LB: loop body
LE: loop exit
PB: predicated region body
PF: predicated region fallthrough
CT: control target
= control target key end

     0   :  { %11 = vsyncpa [#allocation3], 0  ;;  %s648_s0 = inlined_call_operand.hbm [shape: bf16[8,128], index: 0, kind: input, shape index: {}]   ;;  %s649_s1 = inlined_call_operand.hbm [shape: f32[8,128], index: 1, kind: input, shape index: {}]   ;;  %s650_s2 = inlined_call_operand.hbm [shape: bf16[128,128], index: 2, kind: input, shape index: {}]   ;;  %s651_s3 = inlined_call_operand.vmem [shape: f32[1,128], index: 3, kind: input, shape index: {}]   ;;  %s652_s4 = inlined_call_operand.hbm [shape: bf16[128,128], index: 4, kind: input, shape index: {}]   ;;  %s653_s5 = inlined_call_operand.vmem [shape: f32[1,128], index: 5, kind: input, shape index: {}]   ;;  %s654_s6 = inlined_call_operand.hbm [shape: f32[1,1], index: 6, kind: output, shape index: {}]  }
   0x1   :  { %12 = vsyncpa [#allocation6], 0 }
   0x2   :  { %13 = vsyncpa [#allocation9], 0 }
   0x3   :  { %14 = vsyncpa [#allocation4], 0  ;;  %s583_s21 = smov [#allocation5]   ;;  %s584_s23 = smov [#allocation2]  }
   0x4   :  { %s31_s22 = sshll.u32 %s583_s21, 4  ;;  %s21_s24 = sshll.u32 %s584_s23, 4  ;;  %s32_s22 = int_to_ptr.vmem [resolvable:$true] %s31_s22  ;;  %s22_s24 = int_to_ptr.vmem [resolvable:$true] %s21_s24 }
   0x5   :  { %s495_s25 = scalar_lea.vmem %s32_s22, 128  ;;  %p500_p1 = scmp.lt.s32.totalorder %s32_s22, %s32_s22 }
   0x6   :  { %p496_p0 = scmp.ne.s32.totalorder %s32_s22, %s495_s25  ;;  %p501_p2 = scmp.lt.s32.totalorder %s495_s25, %s495_s25 }
   0x8   :  { %p502_p3 = por %p501_p2, %p500_p1 }
   0xa   :  { %p503_p4 = pnand %p502_p3, %p496_p0 }
   0xc   :  { %506 = shalt.err (!%p503_p4)
}
   0xd   :  { %34 = dma.hbm_to_vmem [thread:$0]  %s649_s1, 128, %s32_s22, [#allocation6]  }
   0xe   :  { %s515_s28 = scalar_lea.vmem %s22_s24, 64  ;;  %p520_p6 = scmp.lt.s32.totalorder %s22_s24, %s22_s24 }
   0xf   :  { %p516_p5 = scmp.ne.s32.totalorder %s22_s24, %s515_s28  ;;  %p521_p7 = scmp.lt.s32.totalorder %s515_s28, %s515_s28 }
  0x11   :  { %p522_p8 = por %p521_p7, %p520_p6 }
  0x13   :  { %p523_p9 = pnand %p522_p8, %p516_p5 }
  0x15   :  { %526 = shalt.err (!%p523_p9)
}
  0x16   :  { %24 = dma.hbm_to_vmem [thread:$0]  %s648_s0, 64, %s22_s24, [#allocation3]  }
  0x17   :  { %s585_s7 = smov [#allocation7]  }
  0x18   :  { %s40_s8 = sshll.u32 %s585_s7, 4  ;;  %s41_s8 = int_to_ptr.vmem [resolvable:$true] %s40_s8 }
  0x19   :  { %s535_s9 = scalar_lea.vmem %s41_s8, 1024  ;;  %p540_p11 = scmp.lt.s32.totalorder %s41_s8, %s41_s8 }
  0x1a   :  { %p536_p10 = scmp.ne.s32.totalorder %s41_s8, %s535_s9  ;;  %p541_p12 = scmp.lt.s32.totalorder %s535_s9, %s535_s9 }
  0x1c   :  { %p542_p13 = por %p541_p12, %p540_p11 }
  0x1e   :  { %p543_p0 = pnand %p542_p13, %p536_p10 }
  0x20   :  { %546 = shalt.err (!%p543_p0)
}
  0x21   :  { %s586_s1 = smov 64   ;;  %s587_s10 = smov 4  }
  0x22   :  { %46 = dma.hbm_to_vmem [thread:$0]  %s650_s2, 1024, %s41_s8, [#allocation6], %s586_s1, %s586_s1, %s587_s10  }
  0x23   :  { %s588_s13 = smov [#allocation8]  }
  0x24   :  { %s54_s14 = sshll.u32 %s588_s13, 4  ;;  %s55_s14 = int_to_ptr.vmem [resolvable:$true] %s54_s14 }
  0x25   :  { %s555_s0 = scalar_lea.vmem %s55_s14, 1024  ;;  %p560_p2 = scmp.lt.s32.totalorder %s55_s14, %s55_s14 }
  0x26   :  { %p556_p1 = scmp.ne.s32.totalorder %s55_s14, %s555_s0  ;;  %p561_p3 = scmp.lt.s32.totalorder %s555_s0, %s555_s0 }
  0x28   :  { %p562_p4 = por %p561_p3, %p560_p2 }
  0x2a   :  { %p563_p5 = pnand %p562_p4, %p556_p1 }
  0x2c   :  { %566 = shalt.err (!%p563_p5)
}
  0x2d   :  { %60 = dma.hbm_to_vmem [thread:$0]  %s652_s4, 1024, %s55_s14, [#allocation9], %s586_s1, %s586_s1, %s587_s10  }
  0x2e   :  { %575 = dma.done.wait [#allocation3], 64  }
  0x2f   :  { %576 = vsyncadd [#allocation3], 4294967232 }
  0x30   :  { %577 = dma.done.wait [#allocation6], 1152  }
  0x31   :  { %578 = vsyncadd [#allocation6], 4294966144 }
  0x32   :  { %579 = dma.done.wait [#allocation9], 1024  }
  0x33   :  { %580 = vsyncadd [#allocation9], 4294966272  ;;  %v589_v0 = vmov 0.0   ;;  %vm590_vm0 = vmmov 0   ;;  %v463_v1 = vld [vmem:[#allocation7 + $0x38] sm:$0xff]   ;;  %v464_v2 = vld [vmem:[#allocation7 + $0x30] sm:$0xff]   ;;  %v319_v40 = vlaneseq }
  0x34   :  { %410 = vmatprep.subr.bf16.mxu0 %v589_v0  ;;  %426 = vmatprep.mubr.msk.bf16.mxu0 %vm590_vm0, %v589_v0  ;;  %v465_v3 = vld [vmem:[#allocation7 + $0x28] sm:$0xff]   ;;  %v471_v4 = vld [vmem:[#allocation8 + $0x38] sm:$0xff]   ;;  %v466_v5 = vld [vmem:[#allocation7 + $0x20] sm:$0xff]   ;;  %s591_s22 = smov [#allocation10]  }
  0x35   :  { %430 = vmatprep.subr.bf16.mxu1 %v589_v0  ;;  %446 = vmatprep.mubr.msk.bf16.mxu1 %vm590_vm0, %v589_v0  ;;  %v472_v6 = vld [vmem:[#allocation8 + $0x30] sm:$0xff]   ;;  %v467_v7 = vld [vmem:[#allocation7 + $0x18] sm:$0xff]   ;;  %v473_v8 = vld [vmem:[#allocation8 + $0x28] sm:$0xff]   ;;  %v320_v42 = vand.u32 127, %v319_v40 }
  0x36   :  { %411 = vmatpush3.bf16.msra.mxu0 %v463_v1  ;;  %431 = vmatpush3.bf16.msra.mxu1 %v471_v4  ;;  %v468_v9 = vld [vmem:[#allocation7 + $0x10] sm:$0xff]   ;;  %v474_v10 = vld [vmem:[#allocation8 + $0x20] sm:$0xff]   ;;  %v469_v11 = vld [vmem:[#allocation7 + $0x8] sm:$0xff]  }
  0x37   :  { %412 = vmatprep.subr.bf16.mxu0 %v589_v0  ;;  %432 = vmatprep.subr.bf16.mxu1 %v589_v0  ;;  %v475_v12 = vld [vmem:[#allocation8 + $0x18] sm:$0xff]   ;;  %v470_v13 = vld [vmem:[#allocation7] sm:$0xff]   ;;  %v476_v14 = vld [vmem:[#allocation8 + $0x10] sm:$0xff]   ;;  %vm322_vm1 = vcmp.lt.s32.totalorder %v320_v42, 16 }
  0x38   :  { %v76_v15 = vld [vmem:[#allocation2] sm:$0xf]  ;;  %v477_v16 = vld [vmem:[#allocation8 + $0x8] sm:$0xff]   ;;  %v478_v17 = vld [vmem:[#allocation8] sm:$0xff]  }
  0x39   :  { %v373_v18 = vld [vmem:[%s651_s3] ss:$0 sm:$0xff]  ;;  %v301_v41 = vld [vmem:[#allocation5] sm:$0xff] }
  0x3a   :  { %413 = vmatpush3.bf16.msra.mxu0 %v464_v2  ;;  %433 = vmatpush3.bf16.msra.mxu1 %v472_v6  ;;  %v382_v26 = vld [vmem:[%s653_s5] ss:$0 sm:$0xff] }
  0x3b   :  { %414 = vmatprep.subr.bf16.mxu0 %v589_v0  ;;  %434 = vmatprep.subr.bf16.mxu1 %v589_v0 }
  0x3e   :  { %415 = vmatpush3.bf16.msra.mxu0 %v465_v3  ;;  %435 = vmatpush3.bf16.msra.mxu1 %v473_v8 }
  0x3f   :  { %416 = vmatprep.subr.bf16.mxu0 %v589_v0  ;;  %436 = vmatprep.subr.bf16.mxu1 %v589_v0 }
  0x42   :  { %417 = vmatpush3.bf16.msra.mxu0 %v466_v5  ;;  %437 = vmatpush3.bf16.msra.mxu1 %v474_v10 }
  0x43   :  { %418 = vmatprep.subr.bf16.mxu0 %v589_v0  ;;  %438 = vmatprep.subr.bf16.mxu1 %v589_v0 }
  0x46   :  { %419 = vmatpush3.bf16.msra.mxu0 %v467_v7  ;;  %439 = vmatpush3.bf16.msra.mxu1 %v475_v12 }
  0x47   :  { %420 = vmatprep.subr.bf16.mxu0 %v589_v0  ;;  %440 = vmatprep.subr.bf16.mxu1 %v589_v0 }
  0x4a   :  { %421 = vmatpush3.bf16.msra.mxu0 %v468_v9  ;;  %441 = vmatpush3.bf16.msra.mxu1 %v476_v14 }
  0x4b   :  { %422 = vmatprep.subr.bf16.mxu0 %v589_v0  ;;  %442 = vmatprep.subr.bf16.mxu1 %v589_v0 }
  0x4e   :  { %423 = vmatpush3.bf16.msra.mxu0 %v469_v11  ;;  %443 = vmatpush3.bf16.msra.mxu1 %v477_v16 }
  0x4f   :  { %424 = vmatprep.subr.bf16.mxu0 %v589_v0  ;;  %444 = vmatprep.subr.bf16.mxu1 %v589_v0 }
  0x52   :  { %425 = vmatpush3.bf16.msra.mxu0 %v470_v13  ;;  %445 = vmatpush3.bf16.msra.mxu1 %v478_v17 }
  0x55   :  { %427 = vmatmul.mubr.bf16.vlgmr.msra.gmra.mxu0 %v76_v15 }
 0x115   :  { %v182_v19 = vpop.f32.mrf.mxu0 }
 0x116   :  { %v183_v20 = vadd.f32 %v373_v18, %v182_v19 }
 0x117   :  { %v428_v21 = vpop.f32.mrf.mxu0 }
 0x118   :  { %v188_v22 = vmax.f32 %v183_v20, 0.0 }
 0x119   :  { %v185_v23 = vpop.f32.mrf.mxu0 }
 0x11a   :  { %v206_v24 = vpack.c.bf16 %v188_v22, %v188_v22 }
 0x11b   :  { %v429_v25 = vpop.f32.mrf.mxu0 }
 0x11c   :  { %447 = vmatmul.mubr.bf16.vlgmr.msra.gmra.mxu1 %v206_v24 }
 0x1dc   :  { %v295_v27 = vpop.f32.mrf.mxu1 }
 0x1dd   :  { %v296_v28 = vadd.f32 %v382_v26, %v295_v27 }
 0x1de   :  { %v448_v29 = vpop.f32.mrf.mxu1 }
 0x1df   :  { %v391_v30 = vmul.f32 -1.442695, %v296_v28  ;;  %v309_v31 = vand.u32 2147483647, %v296_v28  ;;  %v308_v47 = vmin.f32 %v296_v28, 0.0 }
 0x1e0   :  { %v298_v32 = vpop.f32.mrf.mxu1 }
 0x1e1   :  { %479 = vpow2.f32 %v391_v30  ;;  %v310_v33 = vsub.f32 0.0, %v309_v31 }
 0x1e2   :  { %v449_v34 = vpop.f32.mrf.mxu1 }
 0x1e3   :  { %v311_v35 = vmul.f32 1.442695, %v310_v33 }
 0x1e5   :  { %481 = vpow2.f32 %v311_v35 }
 0x1ee   :  { %v480_v36 = vpop.eup %479 }
 0x1ef   :  { %v305_v37 = vadd.f32 1.0, %v480_v36 }
 0x1f1   :  { %483 = vrcp.f32 %v305_v37 }
 0x1f2   :  { %v482_v38 = vpop.eup %481 }
 0x1f3   :  { %v313_v39 = vadd.f32 1.0, %v482_v38 }
 0x1f5   :  { %485 = vlog2.f32 %v313_v39 }
 0x1fe   :  { %v484_v43 = vpop.eup %483 }
 0x1ff   :  { %v324_v44 = vsub.f32 %v301_v41, %v484_v43 }
 0x201   :  { %v325_v45 = vmul.f32 %v324_v44, %v324_v44 }
 0x202   :  { %v486_v46 = vpop.eup %485 }
 0x203   :  { %v315_v48 = vmul.f32 0.6931472, %v486_v46  ;;  %v326_v49 = vsel %vm322_vm1, %v325_v45, 0.0 }
 0x204   :  { %327 = vadd.xlane.f32.xlu0 %v326_v49 }
 0x205   :  { %v316_v50 = vsub.f32 %v308_v47, %v315_v48 }
 0x207   :  { %v339_v51 = vsub.f32 %v316_v50, %v301_v41 }
 0x209   :  { %v340_v52 = vmul.f32 %v484_v43, %v339_v51 }
 0x20b   :  { %v341_v53 = vsel %vm322_vm1, %v340_v52, 0.0 }
 0x20c   :  { %342 = vadd.xlane.f32.xlu0 %v341_v53 }
 0x28d   :  { %v328_v54 = vpop.xlane.xlu0 %327 }
 0x28e   :  { %v329_v55 = vrot.slane %v328_v54, 4 }
 0x290   :  { %v330_v56 = vadd.f32 %v329_v55, %v328_v54 }
 0x292   :  { %v331_v57 = vrot.slane %v330_v56, 2 }
 0x294   :  { %v332_v58 = vadd.f32 %v331_v57, %v330_v56 }
 0x295   :  { %v343_v59 = vpop.xlane.xlu0 %342 }
 0x296   :  { %v344_v60 = vrot.slane %v343_v59, 4  ;;  %v333_v61 = vrot.slane %v332_v58, 1 }
 0x298   :  { %v345_v62 = vadd.f32 %v344_v60, %v343_v59  ;;  %v334_v63 = vadd.f32 %v333_v61, %v332_v58 }
 0x29a   :  { %v346_v0 = vrot.slane %v345_v62, 2  ;;  %450 = vpush %v334_v63 }
 0x29c   :  { %v347_v1 = vadd.f32 %v346_v0, %v345_v62 }
 0x29e   :  { %v348_v2 = vrot.slane %v347_v1, 1 }
 0x2a0   :  { %v349_v3 = vadd.f32 %v348_v2, %v347_v1 }
 0x2a2   :  { %452 = vpush %v349_v3 }
 0x2cb   :  { %s451_s3 = spop %450 }
 0x2cc   :  { %s338_s5 = smul.f32 0.0078125, %s451_s3 }
 0x2d3   :  { %s453_s19 = spop %452 }
 0x2d4   :  { %s353_s20 = smul.f32 0.125, %s453_s19 }
 0x2d6   :  { %s354_s21 = sadd.f32 %s353_s20, %s338_s5 }
 0x2d8   :  { %356 = sst [smem:[#allocation10]] %s354_s21 }
 0x2d9   :  { %364 = dma.smem_to_hbm %s591_s22, 16, %s654_s6, [#allocation4]  }
 0x2da   :  { %581 = dma.done.wait [#allocation4], 16  }
 0x2db   :  { %582 = vsyncadd [#allocation4], 4294967280 }
 0x2dc   :  { %368 = sfence }
 0x2dd   :  { %369 = vsyncpa [#allocation3], 1 }
 0x2de   :  { %370 = vsyncpa [#allocation6], 1 }
 0x2df   :  { %371 = vsyncpa [#allocation9], 1 }
 0x2e0   :  { %372 = vsyncpa [#allocation4], 1 }

</bundles_post_ra>
